<compile_context>
chip_gen: v7x
topology: tpu7x:2x2x1
jax: 0.10.0
libtpu: 0.0.40
codegen_flags: <defaults>
</compile_context>

<pallas_src>
import functools

import jax
import jax.numpy as jnp
from jax.experimental import pallas as pl
from jax.experimental.pallas import tpu as pltpu


def _round_up(n, m):
    return ((n + m - 1) // m) * m


def _device_kind():
    try:
        return jax.devices()[0].device_kind.lower()
    except Exception:  # pragma: no cover
        return ""


def _device_tuning(hidden_size):
    """Per-TPU-generation (tile_m, tile_i, vmem_limit_bytes)."""
    kind = _device_kind()
    if "v7" in kind:
        # Only 64 MiB physical VMEM: cap the row tile, leave scratch headroom.
        tm = 512 if hidden_size <= 4096 else 256
        return tm, 512, 56 << 20
    if "v5" in kind:
        # v5e roofline crossover ~240 FLOPs/byte: tm ~512 is already MXU-bound.
        return 512, 512, 96 << 20
    if "v6" in kind:
        # 128 MiB VMEM, crossover ~670 FLOPs/byte: go big on M for prefill.
        tm = 1024 if hidden_size <= 4096 else 512
        return tm, 512, 100 << 20
    # Unknown part: conservative defaults.
    return 512, 512, 64 << 20


def _llama_mlp_kernel(x_ref, wg_ref, wu_ref, wd_ref, o_ref, acc_ref):
    # Grid = (M tiles, I tiles); the intermediate-axis reduction is the
    # innermost ("arbitrary") grid axis -> accumulator keys on program_id(1).
    j = pl.program_id(1)

    x = x_ref[...]
    # Gate / up projections for this intermediate chunk (f32 MXU accumulation).
    g = jnp.dot(x, wg_ref[...], preferred_element_type=jnp.float32)
    u = jnp.dot(x, wu_ref[...], preferred_element_type=jnp.float32)
    # SiLU(g) * u   (sigmoid -> EUP slot, multiplies -> VPU).
    h = (g * jax.nn.sigmoid(g)) * u
    # Partial down_proj contribution of this chunk; keep f32 accumulation.
    part = jnp.dot(
        h.astype(wd_ref.dtype), wd_ref[...], preferred_element_type=jnp.float32
    )

    # First reduction step writes directly (saves the zero-fill + add pass).
    @pl.when(j == 0)
    def _():
        acc_ref[...] = part

    @pl.when(j > 0)
    def _():
        acc_ref[...] += part

    @pl.when(j == pl.num_programs(1) - 1)
    def _():
        o_ref[...] = acc_ref[...].astype(o_ref.dtype)


@functools.partial(
    jax.jit,
    static_argnames=("tile_m", "tile_i", "vmem_limit_bytes", "weight_buffers"),
)
def llama_mlp(x, w_gate, w_up, w_down, *, tile_m=None, tile_i=None,
              vmem_limit_bytes=None, weight_buffers=2):
    """x: (B, S, H); w_gate/w_up: (H, I); w_down: (I, H) -> (B, S, H)."""
    B, S, H = x.shape
    I = w_gate.shape[1]
    assert w_gate.shape == (H, I) and w_up.shape == (H, I) and w_down.shape == (I, H)

    d_tm, d_ti, d_vmem = _device_tuning(H)
    tile_m = d_tm if tile_m is None else tile_m
    tile_i = d_ti if tile_i is None else tile_i
    vmem_limit_bytes = d_vmem if vmem_limit_bytes is None else vmem_limit_bytes

    tile_i = min(tile_i, I)
    assert I % tile_i == 0, "intermediate_size must be divisible by tile_i"
    assert tile_i % 128 == 0 or tile_i == I, "tile_i must be lane-aligned"

    M = B * S
    x2d = x.reshape(M, H)

    # Row tile: clamp to the problem size, rounded to 16 (bf16 sublane pack).
    tm = min(tile_m, _round_up(M, 16))
    # v7x has two TensorCores: make sure large-M (prefill) inputs land on at
    # least two "parallel" M tiles so both cores run.  On 1-TC parts splitting
    # a single tile would only re-stream the weights, so leave it alone.
    if "v7" in _device_kind() and tm >= M and M >= 512:
        tm = _round_up((M + 1) // 2, 16)
    m_pad = _round_up(M, tm)
    if m_pad != M:
        x2d = jnp.pad(x2d, ((0, m_pad - M), (0, 0)))

    # Optional deeper buffering of the weight streams for decode-sized M
    # (single M tile): with no adjacent compute to hide DMA turnaround behind,
    # a third weight buffer keeps HBM saturated.  Default 2 (double buffer).
    w_pipeline = pl.Buffered(weight_buffers) if weight_buffers > 2 else None

    def _wspec(shape, index_map):
        if w_pipeline is None:
            return pl.BlockSpec(shape, index_map)
        return pl.BlockSpec(shape, index_map, pipeline_mode=w_pipeline)

    out2d = pl.pallas_call(
        _llama_mlp_kernel,
        out_shape=jax.ShapeDtypeStruct((m_pad, H), x.dtype),
        grid_spec=pltpu.PrefetchScalarGridSpec(
            num_scalar_prefetch=0,
            grid=(m_pad // tm, I // tile_i),
            in_specs=[
                pl.BlockSpec((tm, H), lambda i, j: (i, 0)),        # x row tile
                _wspec((H, tile_i), lambda i, j: (0, j)),          # W_gate chunk
                _wspec((H, tile_i), lambda i, j: (0, j)),          # W_up chunk
                _wspec((tile_i, H), lambda i, j: (j, 0)),          # W_down chunk
            ],
            out_specs=pl.BlockSpec((tm, H), lambda i, j: (i, 0)),  # out row tile
            scratch_shapes=[pltpu.VMEM((tm, H), jnp.float32)],     # f32 acc
        ),
        compiler_params=pltpu.CompilerParams(
            # M tiles are independent (megacore-shardable); I is a reduction.
            dimension_semantics=("parallel", "arbitrary"),
            vmem_limit_bytes=vmem_limit_bytes,
        ),
    )(x2d, w_gate, w_up, w_down)

    # TODO(synk): for decode on v7x (single M tile), split the I reduction
    # 2-way across the TensorCores with partial (tm, H) outputs summed outside
    # the kernel, so the second core does not idle.
    # TODO(synk): int8 (v5e/v6e) / fp8 (v7x) weight storage with in-kernel
    # dequant would halve the weight-streaming floor in the decode regime.

    return out2d[:M].reshape(B, S, H)


def _reference_mlp(x, w_gate, w_up, w_down):
    xf = x.astype(jnp.float32)
    g = jnp.einsum("bsh,hi->bsi", xf, w_gate.astype(jnp.float32))
    u = jnp.einsum("bsh,hi->bsi", xf, w_up.astype(jnp.float32))
    h = jax.nn.silu(g) * u
    return jnp.einsum("bsi,ih->bsh", h, w_down.astype(jnp.float32))


if __name__ == "__main__":
    # Small LlamaMLP config: hidden_size=128, intermediate_size=512.
    batch, seq, hidden, intermediate = 2, 8, 128, 512

    key = jax.random.PRNGKey(0)
    kx, kg, ku, kd = jax.random.split(key, 4)

    x = jax.random.normal(kx, (batch, seq, hidden), dtype=jnp.float32).astype(
        jnp.bfloat16
    )
    w_gate = (
        jax.random.normal(kg, (hidden, intermediate), dtype=jnp.float32) * 0.02
    ).astype(jnp.bfloat16)
    w_up = (
        jax.random.normal(ku, (hidden, intermediate), dtype=jnp.float32) * 0.02
    ).astype(jnp.bfloat16)
    w_down = (
        jax.random.normal(kd, (intermediate, hidden), dtype=jnp.float32) * 0.02
    ).astype(jnp.bfloat16)

    ref = _reference_mlp(x, w_gate, w_up, w_down)

    # 1) Auto-tuned tiles for the local TPU generation (single I tile here).
    out = jax.block_until_ready(llama_mlp(x, w_gate, w_up, w_down))
    assert out.shape == (batch, seq, hidden)
    assert jnp.allclose(out.astype(jnp.float32), ref, atol=5e-3, rtol=5e-2)

    # 2) Explicit small tiles that exercise the multi-step I-reduction path.
    out2 = jax.block_until_ready(
        llama_mlp(x, w_gate, w_up, w_down, tile_m=16, tile_i=128)
    )
    assert jnp.allclose(out2.astype(jnp.float32), ref, atol=5e-3, rtol=5e-2)

    print("KERNEL_OK")
</pallas_src>

<mosaic_0001>
module attributes {stable_mosaic.version = 11 : i64} {
  func.func @_llama_mlp_kernel(%arg0: i32, %arg1: i32, %arg2: memref<16x128xbf16, #tpu.memory_space<vmem>>, %arg3: memref<128x512xbf16, #tpu.memory_space<vmem>>, %arg4: memref<128x512xbf16, #tpu.memory_space<vmem>>, %arg5: memref<512x128xbf16, #tpu.memory_space<vmem>>, %arg6: memref<16x128xbf16, #tpu.memory_space<vmem>>, %arg7: memref<16x128xf32, #tpu.memory_space<vmem>>) attributes {dimension_semantics = [#tpu.dimension_semantics<parallel>, #tpu.dimension_semantics<arbitrary>], iteration_bounds = array<i64: 1, 1>, scalar_prefetch = 0 : i64, scratch_operands = 1 : i64, tpu.core_type = #tpu.core_type<tc>, window_params = [{transform_indices = @transform_0, window_bounds = array<i64: 16, 128>}, {transform_indices = @transform_1, window_bounds = array<i64: 128, 512>}, {transform_indices = @transform_2, window_bounds = array<i64: 128, 512>}, {transform_indices = @transform_3, window_bounds = array<i64: 512, 128>}, {transform_indices = @transform_4, window_bounds = array<i64: 16, 128>}]} {
    %c0 = arith.constant 0 : index
    %c0_0 = arith.constant 0 : index
    %0 = vector.load %arg2[%c0, %c0_0] : memref<16x128xbf16, #tpu.memory_space<vmem>>, vector<16x128xbf16>
    %c0_1 = arith.constant 0 : index
    %c0_2 = arith.constant 0 : index
    %1 = vector.load %arg3[%c0_1, %c0_2] : memref<128x512xbf16, #tpu.memory_space<vmem>>, vector<128x512xbf16>
    %cst = arith.constant dense<0.000000e+00> : vector<16x512xf32>
    %2 = tpu.matmul %0, %1, %cst {dimension_numbers = #tpu.dot_dimension_numbers<[1], [0], [0], [1], [0, 0, 1, 1], [], []>} : vector<16x128xbf16>, vector<128x512xbf16>, vector<16x512xf32> -> vector<16x512xf32>
    %c0_3 = arith.constant 0 : index
    %c0_4 = arith.constant 0 : index
    %3 = vector.load %arg4[%c0_3, %c0_4] : memref<128x512xbf16, #tpu.memory_space<vmem>>, vector<128x512xbf16>
    %cst_5 = arith.constant dense<0.000000e+00> : vector<16x512xf32>
    %4 = tpu.matmul %0, %3, %cst_5 {dimension_numbers = #tpu.dot_dimension_numbers<[1], [0], [0], [1], [0, 0, 1, 1], [], []>} : vector<16x128xbf16>, vector<128x512xbf16>, vector<16x512xf32> -> vector<16x512xf32>
    %5 = arith.negf %2 : vector<16x512xf32>
    %6 = math.exp %5 : vector<16x512xf32>
    %cst_6 = arith.constant 1.000000e+00 : f32
    %7 = vector.broadcast %cst_6 : f32 to vector<16x512xf32>
    %8 = arith.addf %7, %6 : vector<16x512xf32>
    %9 = arith.divf %7, %8 : vector<16x512xf32>
    %10 = arith.mulf %2, %9 : vector<16x512xf32>
    %11 = arith.mulf %10, %4 : vector<16x512xf32>
    %12 = arith.truncf %11 : vector<16x512xf32> to vector<16x512xbf16>
    %c0_7 = arith.constant 0 : index
    %c0_8 = arith.constant 0 : index
    %13 = vector.load %arg5[%c0_7, %c0_8] : memref<512x128xbf16, #tpu.memory_space<vmem>>, vector<512x128xbf16>
    %cst_9 = arith.constant dense<0.000000e+00> : vector<16x128xf32>
    %14 = tpu.matmul %12, %13, %cst_9 {dimension_numbers = #tpu.dot_dimension_numbers<[1], [0], [0], [1], [0, 0, 1, 1], [], []>} : vector<16x512xbf16>, vector<512x128xbf16>, vector<16x128xf32> -> vector<16x128xf32>
    %c0_i32 = arith.constant 0 : i32
    %15 = arith.cmpi eq, %arg1, %c0_i32 : i32
    %16 = arith.extui %15 : i1 to i32
    %c0_i32_10 = arith.constant 0 : i32
    %17 = arith.cmpi ne, %16, %c0_i32_10 : i32
    scf.if %17 {
      %c0_15 = arith.constant 0 : index
      %c0_16 = arith.constant 0 : index
      %24 = vector.load %arg7[%c0_15, %c0_16] : memref<16x128xf32, #tpu.memory_space<vmem>>, vector<16x128xf32>
      tpu.vector_store %arg7[%c0_15, %c0_16], %14 {strides = array<i32>} : memref<16x128xf32, #tpu.memory_space<vmem>>, vector<16x128xf32>,
    } else {
    }
    %c0_i32_11 = arith.constant 0 : i32
    %18 = arith.cmpi sgt, %arg1, %c0_i32_11 : i32
    %19 = arith.extui %18 : i1 to i32
    %c0_i32_12 = arith.constant 0 : i32
    %20 = arith.cmpi ne, %19, %c0_i32_12 : i32
    scf.if %20 {
      %c0_15 = arith.constant 0 : index
      %c0_16 = arith.constant 0 : index
      %24 = vector.load %arg7[%c0_15, %c0_16] : memref<16x128xf32, #tpu.memory_space<vmem>>, vector<16x128xf32>
      %25 = arith.addf %24, %14 : vector<16x128xf32>
      %c0_17 = arith.constant 0 : index
      %c0_18 = arith.constant 0 : index
      %26 = vector.load %arg7[%c0_17, %c0_18] : memref<16x128xf32, #tpu.memory_space<vmem>>, vector<16x128xf32>
      tpu.vector_store %arg7[%c0_17, %c0_18], %25 {strides = array<i32>} : memref<16x128xf32, #tpu.memory_space<vmem>>, vector<16x128xf32>,
    } else {
    }
    %c0_i32_13 = arith.constant 0 : i32
    %21 = arith.cmpi eq, %arg1, %c0_i32_13 : i32
    %22 = arith.extui %21 : i1 to i32
    %c0_i32_14 = arith.constant 0 : i32
    %23 = arith.cmpi ne, %22, %c0_i32_14 : i32
    scf.if %23 {
      %c0_15 = arith.constant 0 : index
      %c0_16 = arith.constant 0 : index
      %24 = vector.load %arg7[%c0_15, %c0_16] : memref<16x128xf32, #tpu.memory_space<vmem>>, vector<16x128xf32>
      %25 = arith.truncf %24 : vector<16x128xf32> to vector<16x128xbf16>
      %c0_17 = arith.constant 0 : index
      %c0_18 = arith.constant 0 : index
      %26 = vector.load %arg6[%c0_17, %c0_18] : memref<16x128xbf16, #tpu.memory_space<vmem>>, vector<16x128xbf16>
      tpu.vector_store %arg6[%c0_17, %c0_18], %25 {strides = array<i32>} : memref<16x128xbf16, #tpu.memory_space<vmem>>, vector<16x128xbf16>,
    } else {
    }
    return
  }
  func.func @transform_0(%arg0: i32, %arg1: i32) -> (i32, i32) {
    %c0_i32 = arith.constant 0 : i32
    %c0_i32_0 = arith.constant 0 : i32
    return %arg0, %c0_i32 : i32, i32
  }
  func.func @transform_1(%arg0: i32, %arg1: i32) -> (i32, i32) {
    %c0_i32 = arith.constant 0 : i32
    %c0_i32_0 = arith.constant 0 : i32
    return %c0_i32, %arg1 : i32, i32
  }
  func.func @transform_2(%arg0: i32, %arg1: i32) -> (i32, i32) {
    %c0_i32 = arith.constant 0 : i32
    %c0_i32_0 = arith.constant 0 : i32
    return %c0_i32, %arg1 : i32, i32
  }
  func.func @transform_3(%arg0: i32, %arg1: i32) -> (i32, i32) {
    %c0_i32 = arith.constant 0 : i32
    %c0_i32_0 = arith.constant 0 : i32
    return %arg1, %c0_i32 : i32, i32
  }
  func.func @transform_4(%arg0: i32, %arg1: i32) -> (i32, i32) {
    %c0_i32 = arith.constant 0 : i32
    %c0_i32_0 = arith.constant 0 : i32
    return %arg0, %c0_i32 : i32, i32
  }
}

</mosaic_0001>

<bundles_post_ra>
// kernel: llama_mlp.1
= control target key start
LH: loop header
LB: loop body
LE: loop exit
PB: predicated region body
PF: predicated region fallthrough
CT: control target
= control target key end

     0   :  { %9 = vsyncpa [#allocation4], 0  ;;  %s1668_s0 = inlined_call_operand.hbm [shape: bf16[16,128], index: 0, kind: input, shape index: {}]   ;;  %s1669_s1 = inlined_call_operand.hbm [shape: bf16[128,512], index: 1, kind: input, shape index: {}]   ;;  %s1670_s2 = inlined_call_operand.hbm [shape: bf16[128,512], index: 2, kind: input, shape index: {}]   ;;  %s1671_s3 = inlined_call_operand.hbm [shape: bf16[512,128], index: 3, kind: input, shape index: {}]   ;;  %s1672_s4 = inlined_call_operand.hbm [shape: bf16[16,128], index: 4, kind: output, shape index: {}]  }
   0x1   :  { %10 = vsyncpa [#allocation7], 0 }
   0x2   :  { %11 = vsyncpa [#allocation10], 0 }
   0x3   :  { %12 = vsyncpa [#allocation5], 0  ;;  %s1541_s15 = smov [#allocation6]   ;;  %s1423_s19 = scalar_lea.hbm %s1669_s1, 4096 }
   0x4   :  { %s30_s16 = sshll.u32 %s1541_s15, 4  ;;  %p1424_p0 = scmp.ne.s32.totalorder %s1669_s1, %s1423_s19  ;;  %s31_s16 = int_to_ptr.vmem [resolvable:$true] %s30_s16 }
   0x5   :  { %p1427_p1 = scmp.lt.u32.totalorder %s1423_s19, %s1669_s1 }
   0x7   :  { %p1429_p2 = pnand %p1427_p1, %p1424_p0 }
   0x9   :  { %1432 = shalt.err (!%p1429_p2)
}
   0xa   :  { %s1433_s24 = scalar_lea.vmem %s31_s16, 4096  ;;  %p1438_p4 = scmp.lt.s32.totalorder %s31_s16, %s31_s16 }
   0xb   :  { %p1434_p3 = scmp.ne.s32.totalorder %s31_s16, %s1433_s24  ;;  %p1439_p5 = scmp.lt.s32.totalorder %s1433_s24, %s1433_s24 }
   0xd   :  { %p1440_p6 = por %p1439_p5, %p1438_p4 }
   0xf   :  { %p1441_p7 = pnand %p1440_p6, %p1434_p3 }
  0x11   :  { %1444 = shalt.err (!%p1441_p7)
}
  0x12   :  { %s1542_s25 = smov 256   ;;  %s1543_s26 = smov 16  }
  0x13   :  { %36 = dma.hbm_to_vmem [thread:$0]  %s1669_s1, 4096, %s31_s16, [#allocation7], %s1542_s25, %s1542_s25, %s1543_s26  }
  0x14   :  { %s1544_s29 = smov [#allocation3]   ;;  %s1445_s7 = scalar_lea.hbm %s1668_s0, 128 }
  0x15   :  { %s18_s30 = sshll.u32 %s1544_s29, 4  ;;  %p1446_p8 = scmp.ne.s32.totalorder %s1668_s0, %s1445_s7  ;;  %s19_s30 = int_to_ptr.vmem [resolvable:$true] %s18_s30 }
  0x16   :  { %p1449_p9 = scmp.lt.u32.totalorder %s1445_s7, %s1668_s0 }
  0x18   :  { %p1451_p10 = pnand %p1449_p9, %p1446_p8 }
  0x1a   :  { %1454 = shalt.err (!%p1451_p10)
}
  0x1b   :  { %s1455_s12 = scalar_lea.vmem %s19_s30, 128  ;;  %p1460_p12 = scmp.lt.s32.totalorder %s19_s30, %s19_s30 }
  0x1c   :  { %p1456_p11 = scmp.ne.s32.totalorder %s19_s30, %s1455_s12  ;;  %p1461_p13 = scmp.lt.s32.totalorder %s1455_s12, %s1455_s12 }
  0x1e   :  { %p1462_p0 = por %p1461_p13, %p1460_p12 }
  0x20   :  { %p1463_p1 = pnand %p1462_p0, %p1456_p11 }
  0x22   :  { %1466 = shalt.err (!%p1463_p1)
}
  0x23   :  { %s1545_s1 = smov 64   ;;  %s1546_s13 = smov 4  }
  0x24   :  { %24 = dma.hbm_to_vmem [thread:$0]  %s1668_s0, 128, %s19_s30, [#allocation4], %s1545_s1, %s1545_s1, %s1546_s13  }
  0x25   :  { %s1547_s16 = smov [#allocation8]   ;;  %s1548_s18 = smov [#allocation9]  }
  0x26   :  { %s42_s17 = sshll.u32 %s1547_s16, 4  ;;  %s54_s19 = sshll.u32 %s1548_s18, 4  ;;  %s43_s17 = int_to_ptr.vmem [resolvable:$true] %s42_s17  ;;  %s1606_s19 = int_to_ptr.vmem [resolvable:$true] %s54_s19 }
  0x27   :  { %s1467_s22 = scalar_lea.hbm %s1670_s2, 4096 }
  0x28   :  { %p1468_p2 = scmp.ne.s32.totalorder %s1670_s2, %s1467_s22  ;;  %p1471_p3 = scmp.lt.u32.totalorder %s1467_s22, %s1670_s2 }
  0x2a   :  { %p1473_p4 = pnand %p1471_p3, %p1468_p2 }
  0x2c   :  { %1476 = shalt.err (!%p1473_p4)
}
  0x2d   :  { %s1477_s0 = scalar_lea.vmem %s43_s17, 4096  ;;  %p1482_p6 = scmp.lt.s32.totalorder %s43_s17, %s43_s17 }
  0x2e   :  { %p1478_p5 = scmp.ne.s32.totalorder %s43_s17, %s1477_s0  ;;  %p1483_p7 = scmp.lt.s32.totalorder %s1477_s0, %s1477_s0 }
  0x30   :  { %p1484_p8 = por %p1483_p7, %p1482_p6 }
  0x32   :  { %p1485_p9 = pnand %p1484_p8, %p1478_p5 }
  0x34   :  { %1488 = shalt.err (!%p1485_p9)
}
  0x35   :  { %48 = dma.hbm_to_vmem [thread:$0]  %s1670_s2, 4096, %s43_s17, [#allocation7], %s1542_s25, %s1542_s25, %s1543_s26  }
  0x36   :  { %s1489_s7 = scalar_lea.hbm %s1671_s3, 4096 }
  0x37   :  { %p1490_p10 = scmp.ne.s32.totalorder %s1671_s3, %s1489_s7  ;;  %p1493_p11 = scmp.lt.u32.totalorder %s1489_s7, %s1671_s3 }
  0x39   :  { %p1495_p12 = pnand %p1493_p11, %p1490_p10 }
  0x3b   :  { %1498 = shalt.err (!%p1495_p12)
}
  0x3c   :  { %s1499_s12 = scalar_lea.vmem %s1606_s19, 4096  ;;  %p1504_p0 = scmp.lt.s32.totalorder %s1606_s19, %s1606_s19 }
  0x3d   :  { %p1500_p13 = scmp.ne.s32.totalorder %s1606_s19, %s1499_s12  ;;  %p1505_p1 = scmp.lt.s32.totalorder %s1499_s12, %s1499_s12 }
  0x3f   :  { %p1506_p2 = por %p1505_p1, %p1504_p0 }
  0x41   :  { %p1507_p3 = pnand %p1506_p2, %p1500_p13 }
  0x43   :  { %1510 = shalt.err (!%p1507_p3)
}
  0x44   :  { %60 = dma.hbm_to_vmem [thread:$0]  %s1671_s3, 4096, %s1606_s19, [#allocation10], %s1545_s1, %s1545_s1, %s1546_s13  }
  0x45   :  { %1533 = dma.done.wait [#allocation4], 128  }
  0x46   :  { %1534 = vsyncadd [#allocation4], 4294967168 }
  0x47   :  { %1535 = dma.done.wait [#allocation7], 8192  }
  0x48   :  { %1536 = vsyncadd [#allocation7], 4294959104 }
  0x49   :  { %1537 = dma.done.wait [#allocation10], 4096  }
  0x4a   :  { %1538 = vsyncadd [#allocation10], 4294963200  ;;  %v1549_v0 = vmov 0   ;;  %v1262_v1 = vld [vmem:[#allocation6 + $0x4] ss:$16 sps:$4 sm:$0xff]   ;;  %v1645_v35 = vld [vmem:[#allocation3] sm:$0xff]  }
  0x4b   :  { %306 = vmatprep.mubr.bf16.mxu0 %v1549_v0  ;;  %349 = vmatprep.mubr.bf16.mxu1 %v1549_v0  ;;  %v1264_v2 = vld [vmem:[#allocation6 + $0xc] ss:$16 sps:$4 sm:$0xff]   ;;  %v1266_v3 = vld [vmem:[#allocation6] ss:$16 sps:$4 sm:$0xff]   ;;  %v1267_v4 = vld [vmem:[#allocation6 + $0x8] ss:$16 sps:$4 sm:$0xff]  }
  0x4c   :  { %274 = vmatprep.subr.bf16.mxu0 %v1262_v1  ;;  %317 = vmatprep.subr.bf16.mxu1 %v1264_v2  ;;  %v1268_v5 = vld [vmem:[#allocation6 + $0x24] ss:$16 sps:$4 sm:$0xff]   ;;  %v1270_v6 = vld [vmem:[#allocation6 + $0x2c] ss:$16 sps:$4 sm:$0xff]   ;;  %v1272_v7 = vld [vmem:[#allocation6 + $0x20] ss:$16 sps:$4 sm:$0xff]  }
  0x4d   :  { %275 = vmatpush1.bf16.msra.mxu0 %v1266_v3  ;;  %318 = vmatpush1.bf16.msra.mxu1 %v1267_v4  ;;  %v1273_v8 = vld [vmem:[#allocation6 + $0x28] ss:$16 sps:$4 sm:$0xff]   ;;  %v1274_v9 = vld [vmem:[#allocation6 + $0x44] ss:$16 sps:$4 sm:$0xff]   ;;  %v1276_v10 = vld [vmem:[#allocation6 + $0x4c] ss:$16 sps:$4 sm:$0xff]  }
  0x4e   :  { %276 = vmatprep.subr.bf16.mxu0 %v1268_v5  ;;  %319 = vmatprep.subr.bf16.mxu1 %v1270_v6  ;;  %v1278_v11 = vld [vmem:[#allocation6 + $0x40] ss:$16 sps:$4 sm:$0xff]   ;;  %v1279_v12 = vld [vmem:[#allocation6 + $0x48] ss:$16 sps:$4 sm:$0xff]   ;;  %v1280_v13 = vld [vmem:[#allocation6 + $0x64] ss:$16 sps:$4 sm:$0xff]  }
  0x4f   :  { %v1282_v14 = vld [vmem:[#allocation6 + $0x6c] ss:$16 sps:$4 sm:$0xff]   ;;  %v1284_v15 = vld [vmem:[#allocation6 + $0x60] ss:$16 sps:$4 sm:$0xff]   ;;  %v1285_v16 = vld [vmem:[#allocation6 + $0x68] ss:$16 sps:$4 sm:$0xff]  }
  0x50   :  { %v1286_v17 = vld [vmem:[#allocation6 + $0x84] ss:$16 sps:$4 sm:$0xff]   ;;  %v1288_v18 = vld [vmem:[#allocation6 + $0x8c] ss:$16 sps:$4 sm:$0xff]   ;;  %v1290_v19 = vld [vmem:[#allocation6 + $0x80] ss:$16 sps:$4 sm:$0xff]  }
  0x51   :  { %277 = vmatpush1.bf16.msra.mxu0 %v1272_v7  ;;  %320 = vmatpush1.bf16.msra.mxu1 %v1273_v8  ;;  %v1291_v20 = vld [vmem:[#allocation6 + $0x88] ss:$16 sps:$4 sm:$0xff]   ;;  %v1292_v21 = vld [vmem:[#allocation6 + $0xa4] ss:$16 sps:$4 sm:$0xff]   ;;  %v1294_v22 = vld [vmem:[#allocation6 + $0xac] ss:$16 sps:$4 sm:$0xff]  }
  0x52   :  { %278 = vmatprep.subr.bf16.mxu0 %v1274_v9  ;;  %321 = vmatprep.subr.bf16.mxu1 %v1276_v10  ;;  %v1296_v23 = vld [vmem:[#allocation6 + $0xa0] ss:$16 sps:$4 sm:$0xff]   ;;  %v1297_v24 = vld [vmem:[#allocation6 + $0xa8] ss:$16 sps:$4 sm:$0xff]   ;;  %v1298_v25 = vld [vmem:[#allocation6 + $0xc4] ss:$16 sps:$4 sm:$0xff]  }
  0x53   :  { %v1300_v26 = vld [vmem:[#allocation6 + $0xcc] ss:$16 sps:$4 sm:$0xff]   ;;  %v1302_v27 = vld [vmem:[#allocation6 + $0xc0] ss:$16 sps:$4 sm:$0xff]   ;;  %v1303_v28 = vld [vmem:[#allocation6 + $0xc8] ss:$16 sps:$4 sm:$0xff]  }
  0x54   :  { %v1304_v29 = vld [vmem:[#allocation6 + $0xe4] ss:$16 sps:$4 sm:$0xff]   ;;  %v1306_v30 = vld [vmem:[#allocation6 + $0xec] ss:$16 sps:$4 sm:$0xff]   ;;  %v1308_v31 = vld [vmem:[#allocation6 + $0xe0] ss:$16 sps:$4 sm:$0xff]  }
  0x55   :  { %279 = vmatpush1.bf16.msra.mxu0 %v1278_v11  ;;  %322 = vmatpush1.bf16.msra.mxu1 %v1279_v12  ;;  %v1309_v32 = vld [vmem:[#allocation6 + $0xe8] ss:$16 sps:$4 sm:$0xff]   ;;  %v1313_v33 = vld [vmem:[#allocation8 + $0x4] ss:$16 sps:$4 sm:$0xff]   ;;  %v1316_v34 = vld [vmem:[#allocation8 + $0xc] ss:$16 sps:$4 sm:$0xff]  }
  0x56   :  { %280 = vmatprep.subr.bf16.mxu0 %v1280_v13  ;;  %323 = vmatprep.subr.bf16.mxu1 %v1282_v14  ;;  %v1311_v36 = vld [vmem:[#allocation8] ss:$16 sps:$4 sm:$0xff]   ;;  %v1314_v37 = vld [vmem:[#allocation8 + $0x8] ss:$16 sps:$4 sm:$0xff]   ;;  %v1319_v38 = vld [vmem:[#allocation8 + $0x24] ss:$16 sps:$4 sm:$0xff]  }
  0x57   :  { %v1322_v39 = vld [vmem:[#allocation8 + $0x2c] ss:$16 sps:$4 sm:$0xff]   ;;  %v1317_v40 = vld [vmem:[#allocation8 + $0x20] ss:$16 sps:$4 sm:$0xff]   ;;  %v1320_v41 = vld [vmem:[#allocation8 + $0x28] ss:$16 sps:$4 sm:$0xff]  }
  0x58   :  { %v1325_v42 = vld [vmem:[#allocation8 + $0x44] ss:$16 sps:$4 sm:$0xff]   ;;  %v1328_v43 = vld [vmem:[#allocation8 + $0x4c] ss:$16 sps:$4 sm:$0xff]   ;;  %v1323_v44 = vld [vmem:[#allocation8 + $0x40] ss:$16 sps:$4 sm:$0xff]  }
  0x59   :  { %281 = vmatpush1.bf16.msra.mxu0 %v1284_v15  ;;  %324 = vmatpush1.bf16.msra.mxu1 %v1285_v16  ;;  %v1326_v45 = vld [vmem:[#allocation8 + $0x48] ss:$16 sps:$4 sm:$0xff]   ;;  %v1331_v46 = vld [vmem:[#allocation8 + $0x64] ss:$16 sps:$4 sm:$0xff]   ;;  %v1334_v47 = vld [vmem:[#allocation8 + $0x6c] ss:$16 sps:$4 sm:$0xff]  }
  0x5a   :  { %282 = vmatprep.subr.bf16.mxu0 %v1286_v17  ;;  %325 = vmatprep.subr.bf16.mxu1 %v1288_v18  ;;  %v1329_v48 = vld [vmem:[#allocation8 + $0x60] ss:$16 sps:$4 sm:$0xff]   ;;  %v1332_v49 = vld [vmem:[#allocation8 + $0x68] ss:$16 sps:$4 sm:$0xff]   ;;  %v1337_v50 = vld [vmem:[#allocation8 + $0x84] ss:$16 sps:$4 sm:$0xff]  }
  0x5b   :  { %v1340_v51 = vld [vmem:[#allocation8 + $0x8c] ss:$16 sps:$4 sm:$0xff]   ;;  %v1335_v52 = vld [vmem:[#allocation8 + $0x80] ss:$16 sps:$4 sm:$0xff]   ;;  %v1338_v53 = vld [vmem:[#allocation8 + $0x88] ss:$16 sps:$4 sm:$0xff]  }
  0x5c   :  { %v1343_v54 = vld [vmem:[#allocation8 + $0xa4] ss:$16 sps:$4 sm:$0xff]   ;;  %v1346_v55 = vld [vmem:[#allocation8 + $0xac] ss:$16 sps:$4 sm:$0xff]   ;;  %v1341_v56 = vld [vmem:[#allocation8 + $0xa0] ss:$16 sps:$4 sm:$0xff]  }
  0x5d   :  { %283 = vmatpush1.bf16.msra.mxu0 %v1290_v19  ;;  %326 = vmatpush1.bf16.msra.mxu1 %v1291_v20  ;;  %v1344_v57 = vld [vmem:[#allocation8 + $0xa8] ss:$16 sps:$4 sm:$0xff]   ;;  %v1349_v58 = vld [vmem:[#allocation8 + $0xc4] ss:$16 sps:$4 sm:$0xff]   ;;  %v1352_v59 = vld [vmem:[#allocation8 + $0xcc] ss:$16 sps:$4 sm:$0xff]  }
  0x5e   :  { %284 = vmatprep.subr.bf16.mxu0 %v1292_v21  ;;  %327 = vmatprep.subr.bf16.mxu1 %v1294_v22  ;;  %v1347_v60 = vld [vmem:[#allocation8 + $0xc0] ss:$16 sps:$4 sm:$0xff]   ;;  %v1350_v61 = vld [vmem:[#allocation8 + $0xc8] ss:$16 sps:$4 sm:$0xff]   ;;  %v1355_v62 = vld [vmem:[#allocation8 + $0xe4] ss:$16 sps:$4 sm:$0xff]  }
  0x5f   :  { %v1358_v63 = vld [vmem:[#allocation8 + $0xec] ss:$16 sps:$4 sm:$0xff]   ;;  %v1356_v1 = vld [vmem:[#allocation8 + $0xe8] ss:$16 sps:$4 sm:$0xff]   ;;  %v1359_v2 = vld [vmem:[#allocation9 + $0x40] sm:$0xff]   ;;  %s1550_s3 = smov [#allocation11]  }
  0x60   :  { %v1360_v3 = vld [vmem:[#allocation9 + $0xc0] sm:$0xff]   ;;  %v1363_v6 = vld [vmem:[#allocation9 + $0x48] sm:$0xff]   ;;  %v1367_v10 = vld [vmem:[#allocation9 + $0x50] sm:$0xff]   ;;  %s1080_s26 = sshll.u32 %s1550_s3, 4  ;;  %s1081_s26 = int_to_ptr.vmem [resolvable:$true] %s1080_s26 }
  0x61   :  { %285 = vmatpush1.bf16.msra.mxu0 %v1296_v23  ;;  %328 = vmatpush1.bf16.msra.mxu1 %v1297_v24  ;;  %v1361_v4 = vld [vmem:[#allocation9] sm:$0xff]   ;;  %v1364_v7 = vld [vmem:[#allocation9 + $0xc8] sm:$0xff]   ;;  %v1368_v11 = vld [vmem:[#allocation9 + $0xd0] sm:$0xff]   ;;  %s1511_s14 = scalar_lea.vmem %s1081_s26, 128  ;;  %p1516_p5 = scmp.lt.s32.totalorder %s1081_s26, %s1081_s26 }
  0x62   :  { %286 = vmatprep.subr.bf16.mxu0 %v1298_v25  ;;  %329 = vmatprep.subr.bf16.mxu1 %v1300_v26  ;;  %v1362_v5 = vld [vmem:[#allocation9 + $0x80] sm:$0xff]   ;;  %v1365_v8 = vld [vmem:[#allocation9 + $0x8] sm:$0xff]   ;;  %v1369_v12 = vld [vmem:[#allocation9 + $0x10] sm:$0xff]   ;;  %p1512_p4 = scmp.ne.s32.totalorder %s1081_s26, %s1511_s14  ;;  %p1517_p6 = scmp.lt.s32.totalorder %s1511_s14, %s1511_s14 }
  0x63   :  { %v1366_v9 = vld [vmem:[#allocation9 + $0x88] sm:$0xff]   ;;  %v1370_v13 = vld [vmem:[#allocation9 + $0x90] sm:$0xff]   ;;  %v1371_v14 = vld [vmem:[#allocation9 + $0x58] sm:$0xff]  }
  0x64   :  { %v1372_v15 = vld [vmem:[#allocation9 + $0xd8] sm:$0xff]   ;;  %v1375_v18 = vld [vmem:[#allocation9 + $0x60] sm:$0xff]   ;;  %v1379_v22 = vld [vmem:[#allocation9 + $0x68] sm:$0xff]   ;;  %p1518_p7 = por %p1517_p6, %p1516_p5 }
  0x65   :  { %287 = vmatpush1.bf16.msra.mxu0 %v1302_v27  ;;  %330 = vmatpush1.bf16.msra.mxu1 %v1303_v28  ;;  %v1373_v16 = vld [vmem:[#allocation9 + $0x18] sm:$0xff]   ;;  %v1376_v19 = vld [vmem:[#allocation9 + $0xe0] sm:$0xff]   ;;  %v1380_v23 = vld [vmem:[#allocation9 + $0xe8] sm:$0xff]  }
  0x66   :  { %288 = vmatprep.subr.bf16.mxu0 %v1304_v29  ;;  %331 = vmatprep.subr.bf16.mxu1 %v1306_v30  ;;  %v1374_v17 = vld [vmem:[#allocation9 + $0x98] sm:$0xff]   ;;  %v1377_v20 = vld [vmem:[#allocation9 + $0x20] sm:$0xff]   ;;  %v1381_v24 = vld [vmem:[#allocation9 + $0x28] sm:$0xff]   ;;  %p1519_p8 = pnand %p1518_p7, %p1512_p4 }
  0x67   :  { %v1378_v21 = vld [vmem:[#allocation9 + $0xa0] sm:$0xff]   ;;  %v1382_v25 = vld [vmem:[#allocation9 + $0xa8] sm:$0xff]   ;;  %v1383_v26 = vld [vmem:[#allocation9 + $0x70] sm:$0xff]  }
  0x68   :  { %v1384_v27 = vld [vmem:[#allocation9 + $0xf0] sm:$0xff]   ;;  %v1387_v30 = vld [vmem:[#allocation9 + $0x78] sm:$0xff]  }
  0x69   :  { %289 = vmatpush1.bf16.msra.mxu0 %v1308_v31  ;;  %332 = vmatpush1.bf16.msra.mxu1 %v1309_v32  ;;  %v1385_v28 = vld [vmem:[#allocation9 + $0x30] sm:$0xff]   ;;  %v1388_v31 = vld [vmem:[#allocation9 + $0xf8] sm:$0xff]  }
  0x6a   :  { %552 = vmatprep.subr.bf16.mxu0 %v1313_v33  ;;  %595 = vmatprep.subr.bf16.mxu1 %v1316_v34  ;;  %v1386_v29 = vld [vmem:[#allocation9 + $0xb0] sm:$0xff]   ;;  %v1389_v32 = vld [vmem:[#allocation9 + $0x38] sm:$0xff]  }
  0x6b   :  { %v1390_v33 = vld [vmem:[#allocation9 + $0xb8] sm:$0xff]  }
  0x6c   :  { %307 = vmatmul.mubr.bf16.vlgmr.msra.gmra.mrb[0].mxu0 %v1645_v35  ;;  %350 = vmatmul.mubr.bf16.vlgmr.msra.gmra.mrb[0].mxu1 %v1645_v35 }
  0x6d   :  { %553 = vmatpush1.bf16.msra.mxu0 %v1311_v36  ;;  %596 = vmatpush1.bf16.msra.mxu1 %v1314_v37 }
  0x6e   :  { %554 = vmatprep.subr.bf16.mxu0 %v1319_v38  ;;  %597 = vmatprep.subr.bf16.mxu1 %v1322_v39 }
  0x6f   :  { %584 = vmatprep.mubr.bf16.mxu0 %v1549_v0  ;;  %627 = vmatprep.mubr.bf16.mxu1 %v1549_v0  ;;  %v1353_v0 = vld [vmem:[#allocation8 + $0xe0] ss:$16 sps:$4 sm:$0xff]  }
  0x71   :  { %555 = vmatpush1.bf16.msra.mxu0 %v1317_v40  ;;  %598 = vmatpush1.bf16.msra.mxu1 %v1320_v41 }
  0x72   :  { %556 = vmatprep.subr.bf16.mxu0 %v1325_v42  ;;  %599 = vmatprep.subr.bf16.mxu1 %v1328_v43 }
  0x75   :  { %557 = vmatpush1.bf16.msra.mxu0 %v1323_v44  ;;  %600 = vmatpush1.bf16.msra.mxu1 %v1326_v45 }
  0x76   :  { %558 = vmatprep.subr.bf16.mxu0 %v1331_v46  ;;  %601 = vmatprep.subr.bf16.mxu1 %v1334_v47 }
  0x79   :  { %559 = vmatpush1.bf16.msra.mxu0 %v1329_v48  ;;  %602 = vmatpush1.bf16.msra.mxu1 %v1332_v49 }
  0x7a   :  { %560 = vmatprep.subr.bf16.mxu0 %v1337_v50  ;;  %603 = vmatprep.subr.bf16.mxu1 %v1340_v51 }
  0x7d   :  { %561 = vmatpush1.bf16.msra.mxu0 %v1335_v52  ;;  %604 = vmatpush1.bf16.msra.mxu1 %v1338_v53 }
  0x7e   :  { %562 = vmatprep.subr.bf16.mxu0 %v1343_v54  ;;  %605 = vmatprep.subr.bf16.mxu1 %v1346_v55 }
  0x81   :  { %563 = vmatpush1.bf16.msra.mxu0 %v1341_v56  ;;  %606 = vmatpush1.bf16.msra.mxu1 %v1344_v57 }
  0x82   :  { %564 = vmatprep.subr.bf16.mxu0 %v1349_v58  ;;  %607 = vmatprep.subr.bf16.mxu1 %v1352_v59 }
  0x85   :  { %565 = vmatpush1.bf16.msra.mxu0 %v1347_v60  ;;  %608 = vmatpush1.bf16.msra.mxu1 %v1350_v61 }
  0x86   :  { %566 = vmatprep.subr.bf16.mxu0 %v1355_v62  ;;  %609 = vmatprep.subr.bf16.mxu1 %v1358_v63 }
  0x89   :  { %567 = vmatpush1.bf16.msra.mxu0 %v1353_v0  ;;  %610 = vmatpush1.bf16.msra.mxu1 %v1356_v1 }
  0x8a   :  { %1208 = vmatprep.subr.bf16.mxu0 %v1359_v2  ;;  %1230 = vmatprep.subr.bf16.mxu1 %v1360_v3 }
  0x8c   :  { %585 = vmatmul.mubr.bf16.vlgmr.msra.gmra.mrb[4].mxu0 %v1645_v35  ;;  %628 = vmatmul.mubr.bf16.vlgmr.msra.gmra.mrb[4].mxu1 %v1645_v35 }
  0x8d   :  { %1209 = vmatpush3.bf16.msra.mxu0 %v1361_v4  ;;  %1231 = vmatpush3.bf16.msra.mxu1 %v1362_v5 }
  0x8e   :  { %1210 = vmatprep.subr.bf16.mxu0 %v1363_v6  ;;  %1232 = vmatprep.subr.bf16.mxu1 %v1364_v7 }
  0x91   :  { %1211 = vmatpush3.bf16.msra.mxu0 %v1365_v8  ;;  %1233 = vmatpush3.bf16.msra.mxu1 %v1366_v9 }
  0x92   :  { %1212 = vmatprep.subr.bf16.mxu0 %v1367_v10  ;;  %1234 = vmatprep.subr.bf16.mxu1 %v1368_v11 }
  0x95   :  { %1213 = vmatpush3.bf16.msra.mxu0 %v1369_v12  ;;  %1235 = vmatpush3.bf16.msra.mxu1 %v1370_v13 }
  0x96   :  { %1214 = vmatprep.subr.bf16.mxu0 %v1371_v14  ;;  %1236 = vmatprep.subr.bf16.mxu1 %v1372_v15 }
  0x99   :  { %1215 = vmatpush3.bf16.msra.mxu0 %v1373_v16  ;;  %1237 = vmatpush3.bf16.msra.mxu1 %v1374_v17 }
  0x9a   :  { %1216 = vmatprep.subr.bf16.mxu0 %v1375_v18  ;;  %1238 = vmatprep.subr.bf16.mxu1 %v1376_v19 }
  0x9d   :  { %1217 = vmatpush3.bf16.msra.mxu0 %v1377_v20  ;;  %1239 = vmatpush3.bf16.msra.mxu1 %v1378_v21 }
  0x9e   :  { %1218 = vmatprep.subr.bf16.mxu0 %v1379_v22  ;;  %1240 = vmatprep.subr.bf16.mxu1 %v1380_v23 }
  0xa1   :  { %1219 = vmatpush3.bf16.msra.mxu0 %v1381_v24  ;;  %1241 = vmatpush3.bf16.msra.mxu1 %v1382_v25 }
  0xa2   :  { %1220 = vmatprep.subr.bf16.mxu0 %v1383_v26  ;;  %1242 = vmatprep.subr.bf16.mxu1 %v1384_v27 }
  0xa5   :  { %1221 = vmatpush3.bf16.msra.mxu0 %v1385_v28  ;;  %1243 = vmatpush3.bf16.msra.mxu1 %v1386_v29 }
  0xa6   :  { %1222 = vmatprep.subr.bf16.mxu0 %v1387_v30  ;;  %1244 = vmatprep.subr.bf16.mxu1 %v1388_v31 }
  0xa9   :  { %1223 = vmatpush3.bf16.msra.mxu0 %v1389_v32  ;;  %1245 = vmatpush3.bf16.msra.mxu1 %v1390_v33 }
 0x13f   :  { %v308_v34 = vpop.f32.mrb[0].mxu0  ;;  %v351_v35 = vpop.f32.mrb[0].mxu1 }
 0x140   :  { %v1159_v36 = vmul.f32 -1.442695, %v308_v34  ;;  %v1161_v37 = vmul.f32 -1.442695, %v351_v35  ;;  %v310_v38 = vpop.f32.mrb[1].mxu0  ;;  %v353_v39 = vpop.f32.mrb[1].mxu1 }
 0x141   :  { %v1160_v40 = vmul.f32 -1.442695, %v310_v38  ;;  %v1162_v41 = vmul.f32 -1.442695, %v353_v39  ;;  %v312_v42 = vpop.f32.mrb[2].mxu0  ;;  %v355_v43 = vpop.f32.mrb[2].mxu1 }
 0x142   :  { %1391 = vpow2.f32 %v1159_v36  ;;  %v1163_v44 = vmul.f32 -1.442695, %v312_v42  ;;  %v314_v45 = vpop.f32.mrb[3].mxu0  ;;  %v357_v46 = vpop.f32.mrb[3].mxu1  ;;  %v1165_v47 = vmul.f32 -1.442695, %v355_v43 }
 0x143   :  { %1393 = vpow2.f32 %v1161_v37  ;;  %v1164_v48 = vmul.f32 -1.442695, %v314_v45  ;;  %v1166_v49 = vmul.f32 -1.442695, %v357_v46 }
 0x144   :  { %1395 = vpow2.f32 %v1160_v40 }
 0x145   :  { %1397 = vpow2.f32 %v1162_v41 }
 0x146   :  { %1399 = vpow2.f32 %v1163_v44 }
 0x147   :  { %1401 = vpow2.f32 %v1165_v47 }
 0x148   :  { %1403 = vpow2.f32 %v1164_v48 }
 0x149   :  { %1405 = vpow2.f32 %v1166_v49 }
 0x14c   :  { %v1392_v50 = vpop.eup %1391 }
 0x14d   :  { %v1394_v51 = vpop.eup %1393  ;;  %v662_v52 = vadd.f32 1.0, %v1392_v50 }
 0x14e   :  { %v1396_v53 = vpop.eup %1395  ;;  %v664_v54 = vadd.f32 1.0, %v1394_v51 }
 0x14f   :  { %v1398_v55 = vpop.eup %1397  ;;  %1407 = vrcp.f32 %v662_v52  ;;  %v663_v56 = vadd.f32 1.0, %v1396_v53 }
 0x150   :  { %v1400_v57 = vpop.eup %1399  ;;  %1409 = vrcp.f32 %v664_v54  ;;  %v665_v58 = vadd.f32 1.0, %v1398_v55 }
 0x151   :  { %v1402_v59 = vpop.eup %1401  ;;  %1411 = vrcp.f32 %v663_v56  ;;  %v666_v60 = vadd.f32 1.0, %v1400_v57 }
 0x152   :  { %v1404_v61 = vpop.eup %1403  ;;  %1413 = vrcp.f32 %v665_v58  ;;  %v668_v62 = vadd.f32 1.0, %v1402_v59 }
 0x153   :  { %v1406_v63 = vpop.eup %1405  ;;  %1415 = vrcp.f32 %v666_v60  ;;  %v667_v0 = vadd.f32 1.0, %v1404_v61 }
 0x154   :  { %1417 = vrcp.f32 %v668_v62  ;;  %v669_v1 = vadd.f32 1.0, %v1406_v63 }
 0x155   :  { %1419 = vrcp.f32 %v667_v0 }
 0x156   :  { %1421 = vrcp.f32 %v669_v1 }
 0x159   :  { %v1408_v2 = vpop.eup %1407 }
 0x15a   :  { %v1410_v3 = vpop.eup %1409  ;;  %v686_v8 = vmul.f32 %v1408_v2, %v308_v34 }
 0x15b   :  { %v1412_v4 = vpop.eup %1411  ;;  %v688_v9 = vmul.f32 %v1410_v3, %v351_v35 }
 0x15c   :  { %v1414_v5 = vpop.eup %1413  ;;  %v687_v11 = vmul.f32 %v1412_v4, %v310_v38 }
 0x15d   :  { %v1416_v6 = vpop.eup %1415  ;;  %v689_v12 = vmul.f32 %v1414_v5, %v353_v39 }
 0x15e   :  { %v1418_v7 = vpop.eup %1417  ;;  %v690_v16 = vmul.f32 %v1416_v6, %v312_v42 }
 0x15f   :  { %v1420_v10 = vpop.eup %1419  ;;  %v586_v13 = vpop.f32.mrb[4].mxu0  ;;  %v692_v17 = vmul.f32 %v1418_v7, %v355_v43 }
 0x160   :  { %v629_v14 = vpop.f32.mrb[4].mxu1  ;;  %v1422_v15 = vpop.eup %1421  ;;  %v694_v18 = vmul.f32 %v686_v8, %v586_v13  ;;  %v691_v22 = vmul.f32 %v1420_v10, %v314_v45 }
 0x161   :  { %v696_v19 = vmul.f32 %v688_v9, %v629_v14  ;;  %v588_v20 = vpop.f32.mrb[5].mxu0  ;;  %v631_v21 = vpop.f32.mrb[5].mxu1  ;;  %v693_v23 = vmul.f32 %v1422_v15, %v357_v46 }
 0x162   :  { %v695_v24 = vmul.f32 %v687_v11, %v588_v20  ;;  %v697_v25 = vmul.f32 %v689_v12, %v631_v21  ;;  %v590_v26 = vpop.f32.mrb[6].mxu0  ;;  %v633_v27 = vpop.f32.mrb[6].mxu1 }
 0x163   :  { %v698_v28 = vmul.f32 %v690_v16, %v590_v26  ;;  %v700_v29 = vmul.f32 %v692_v17, %v633_v27  ;;  %v592_v30 = vpop.f32.mrb[7].mxu0  ;;  %v635_v31 = vpop.f32.mrb[7].mxu1 }
 0x164   :  { %v699_v32 = vmul.f32 %v691_v22, %v592_v30  ;;  %v701_v33 = vmul.f32 %v693_v23, %v635_v31 }
 0x165   :  { %v702_v34 = vpack.c.bf16 %v698_v28, %v694_v18  ;;  %v704_v35 = vpack.c.bf16 %v700_v29, %v696_v19 }
 0x166   :  { %v703_v36 = vpack.c.bf16 %v699_v32, %v695_v24  ;;  %v705_v37 = vpack.c.bf16 %v701_v33, %v697_v25 }
 0x168   :  { %994 = vmatprep.mubr.bf16.mxu0 %v703_v36  ;;  %1035 = vmatprep.mubr.bf16.mxu1 %v705_v37 }
 0x169   :  { %995 = vmatmul.mubr.bf16.vlgmr.msra.gmra.mrb[8].mxu0 %v702_v34  ;;  %1036 = vmatmul.mubr.bf16.vlgmr.msra.gmra.mrb[8].mxu1 %v704_v35 }
 0x23c   :  { %v1224_v38 = vpop.f32.mrb[8].mxu0  ;;  %v1246_v39 = vpop.f32.mrb[8].mxu1 }
 0x23d   :  { %v1225_v40 = vpop.f32.mrb[9].mxu0  ;;  %v1247_v41 = vpop.f32.mrb[9].mxu1 }
 0x23e   :  { %v1226_v42 = vadd.f32 %v1225_v40, %v1224_v38  ;;  %v1248_v43 = vadd.f32 %v1247_v41, %v1246_v39  ;;  %v1227_v44 = vpop.f32.mrb[10].mxu0  ;;  %v1249_v45 = vpop.f32.mrb[10].mxu1 }
 0x23f   :  { %v1228_v46 = vpop.f32.mrb[11].mxu0  ;;  %v1250_v47 = vpop.f32.mrb[11].mxu1 }
 0x240   :  { %v1038_v48 = vadd.f32 %v1248_v43, %v1226_v42  ;;  %v1229_v49 = vadd.f32 %v1228_v46, %v1227_v44  ;;  %v1251_v50 = vadd.f32 %v1250_v47, %v1249_v45 }
 0x242   :  { %v1041_v51 = vadd.f32 %v1251_v50, %v1229_v49 }
 0x244   :  { %v1206_v52 = vpack.c.bf16 %v1041_v51, %v1038_v48 }
 0x246   :  { %1207 = vst [vmem:[#allocation11] sm:$0xff] %v1206_v52  }
 0x247   :  { %1522 = shalt.err (!%p1519_p8)
}
 0x248   :  { %s1523_s17 = scalar_lea.hbm %s1672_s4, 128 }
 0x249   :  { %p1524_p9 = scmp.ne.s32.totalorder %s1672_s4, %s1523_s17  ;;  %p1527_p10 = scmp.lt.u32.totalorder %s1523_s17, %s1672_s4 }
 0x24b   :  { %p1529_p11 = pnand %p1527_p10, %p1524_p9 }
 0x24d   :  { %1532 = shalt.err (!%p1529_p11)
}
 0x24e   :  { %1086 = dma.vmem_to_hbm [thread:$0]  %s1081_s26, 128, %s1672_s4, [#allocation5], %s1545_s1, %s1545_s1, %s1546_s13  }
 0x24f   :  { %1539 = dma.done.wait [#allocation5], 128  }
 0x250   :  { %1540 = vsyncadd [#allocation5], 4294967168 }
 0x251   :  { %1090 = vsyncpa [#allocation4], 1 }
 0x252   :  { %1091 = vsyncpa [#allocation7], 1 }
 0x253   :  { %1092 = vsyncpa [#allocation10], 1 }
 0x254   :  { %1093 = vsyncpa [#allocation5], 1 }

</bundles_post_ra>
